<compile_context>
chip_gen: v7x
topology: tpu7x:2x2x1
jax: 0.10.0
libtpu: 0.0.40
codegen_flags: <defaults>
</compile_context>

<pallas_src>
import jax
import jax.numpy as jnp
from jax.experimental import pallas as pl
from jax.experimental.pallas import tpu as pltpu


def _round_up(n, m):
    return ((n + m - 1) // m) * m


# ----------------------------------------------------------------------------- kernel
def _prior_disc_kernel(x_ref, w0_ref, b0_ref, w1_ref, b1_ref, w2_ref, b2_ref,
                       o_ref):
    # l0 : bf16 MXU matmul (weights pre-transposed to (in, out) -> plain dot,
    #      no per-step weight transpose), f32 accumulate, f32 bias + relu.
    h = jnp.dot(x_ref[...].astype(jnp.bfloat16), w0_ref[...],
                preferred_element_type=jnp.float32)
    h = jnp.maximum(h + b0_ref[...], 0.0)

    # l1
    h = jnp.dot(h.astype(jnp.bfloat16), w1_ref[...],
                preferred_element_type=jnp.float32)
    h = jnp.maximum(h + b1_ref[...], 0.0)

    # l2 : output width 1 -> VPU multiply + lane (XLU) reduction; an N=1 MXU
    #      matmul would waste the whole MXU for a single kept column.
    logit = jnp.sum(h * w2_ref[...], axis=-1, keepdims=True) + b2_ref[...]
    o_ref[...] = jax.nn.sigmoid(logit).astype(o_ref.dtype)


# ----------------------------------------------------------------------------- hw query
def _tpu_info():
    """Best-effort chip query; conservative fallbacks if unavailable.

    Fallbacks: 64 MiB VMEM (safe on every generation incl. v7x) and 1
    TensorCore (never force a batch split unless we KNOW there are 2 TCs)."""
    vmem_cap = 64 << 20
    num_cores = 1
    try:
        info = pltpu.get_tpu_info()
        cap = getattr(info, "vmem_capacity_bytes", None)
        if cap:
            vmem_cap = int(cap)
        for attr in ("num_cores", "num_tensorcores", "tensorcore_count",
                     "cores_per_chip", "num_tensor_cores"):
            v = getattr(info, attr, None)
            if isinstance(v, int) and v > 0:
                num_cores = v
                break
    except Exception:
        pass
    return vmem_cap, num_cores


# ----------------------------------------------------------------------------- param prep
def prepare_params(params):
    """One-time parameter prep (call once, not per forward):
      * transpose W0/W1 from PyTorch (out, in) to (in, out),
      * cast the two big weights to bf16 for the MXU,
      * zero-pad the hidden dim to a multiple of 128 (padded columns are
        inert: bias 0 -> relu 0 -> w2 column 0),
      * reshape biases / w2 to lane-dense 2-D."""
    D = params["w0"].shape[1]
    Dp = _round_up(D, 128)
    pad = Dp - D

    w0t = jnp.pad(params["w0"].T.astype(jnp.bfloat16), ((0, 0), (0, pad)))    # (D, Dp)
    w1t = jnp.pad(params["w1"].T.astype(jnp.bfloat16), ((0, pad), (0, pad)))  # (Dp, Dp)
    return {
        "w0t": w0t,
        "w1t": w1t,
        "b0": jnp.pad(params["b0"].reshape(1, D).astype(jnp.float32), ((0, 0), (0, pad))),
        "b1": jnp.pad(params["b1"].reshape(1, D).astype(jnp.float32), ((0, 0), (0, pad))),
        "w2": jnp.pad(params["w2"].reshape(1, D).astype(jnp.float32), ((0, 0), (0, pad))),
        "b2": params["b2"].reshape(1, 1).astype(jnp.float32),
        "input_dim": D,
    }


# ----------------------------------------------------------------------------- wrapper
def prior_discriminator(x, prepared, *, tb=None, x_buffers=2,
                        vmem_limit_bytes=None):
    """x: (B, D) float32 or bfloat16.  prepared: output of prepare_params()."""
    B, D = x.shape
    assert D == prepared["input_dim"], (D, prepared["input_dim"])
    w0t, w1t = prepared["w0t"], prepared["w1t"]
    Dp = w0t.shape[1]
    assert w0t.shape == (D, Dp) and w1t.shape == (Dp, Dp)

    vmem_cap, num_cores = _tpu_info()
    usable = max(vmem_cap - (8 << 20), 24 << 20)        # leave compiler headroom

    weight_bytes = w0t.size * 2 + w1t.size * 2          # bf16
    single_buf_weights = weight_bytes >= (1 << 20)      # constant index_map ->
    wbuf = 1 if single_buf_weights else 2               # double-buffering wastes VMEM

    # Activation working-set bytes per batch row: pipelined x tiles, in-kernel
    # bf16 casts of x and h, the two f32 h stages, and the tiny logit/output.
    per_row = (x_buffers * D * x.dtype.itemsize
               + 2 * D                                   # bf16 x cast
               + 2 * 4 * Dp                              # f32 h (layer0 / layer1)
               + 2 * Dp                                  # bf16 h cast
               + 16)                                     # (tb, 1) logit / out

    if tb is None:
        # Size the batch tile to VMEM (mem-bound kernel: bigger tiles amortize
        # the ~600-cycle per-grid-step overhead), capped at 2048 rows.
        act_budget = max(usable - wbuf * weight_bytes - (4 << 20), 1 << 20)
        tb = max(8, min(2048, (int(act_budget // per_row) // 8) * 8))
        tb = min(tb, _round_up(B, 8))
        # Only split a single-tile batch when the chip really has >=2 TCs
        # (v7x); on single-TC v5e/v6e the grid is serial and a split is loss.
        if num_cores >= 2 and pl.cdiv(B, tb) < 2 and B >= 16:
            tb = _round_up(pl.cdiv(B, 2), 8)

    grid = (pl.cdiv(B, tb),)

    if vmem_limit_bytes is None:
        est = wbuf * weight_bytes + tb * per_row + (4 << 20)
        # Always pass a limit (v5e's scoped default is only 16 MiB) and clamp
        # to the chip's physical VMEM minus headroom (64 MiB on v7x).
        # TODO(synk): for very large D (whole bf16 W0+W1 residency exceeding
        # usable VMEM, ~3-4k on v7x) switch W0/W1 to K/N-tiled BlockSpecs on a
        # reduction grid axis instead of whole-(Dp, Dp) resident tiles.
        vmem_limit_bytes = int(min(usable, max(est, 32 << 20)))

    w_kwargs = {"pipeline_mode": pl.Buffered(1)} if single_buf_weights else {}
    x_kwargs = {"pipeline_mode": pl.Buffered(x_buffers)} if x_buffers != 2 else {}

    return pl.pallas_call(
        _prior_disc_kernel,
        out_shape=jax.ShapeDtypeStruct((B, 1), x.dtype),
        grid_spec=pltpu.PrefetchScalarGridSpec(
            num_scalar_prefetch=0,
            grid=grid,
            in_specs=[
                pl.BlockSpec((tb, D), lambda i: (i, 0), **x_kwargs),   # x tile
                pl.BlockSpec((D, Dp), lambda i: (0, 0), **w_kwargs),   # W0^T (bf16)
                pl.BlockSpec((1, Dp), lambda i: (0, 0)),               # b0
                pl.BlockSpec((Dp, Dp), lambda i: (0, 0), **w_kwargs),  # W1^T (bf16)
                pl.BlockSpec((1, Dp), lambda i: (0, 0)),               # b1
                pl.BlockSpec((1, Dp), lambda i: (0, 0)),               # w2 (lane-dense)
                pl.BlockSpec((1, 1), lambda i: (0, 0)),                # b2
            ],
            out_specs=pl.BlockSpec((tb, 1), lambda i: (i, 0)),
        ),
        compiler_params=pltpu.CompilerParams(
            dimension_semantics=("parallel",),
            vmem_limit_bytes=vmem_limit_bytes),
    )(x, w0t, prepared["b0"], w1t, prepared["b1"], prepared["w2"],
      prepared["b2"])


# ----------------------------------------------------------------------------- demo / check
def _init_params(key, input_dim):
    """Deterministic synthetic init mirroring nn.Linear shapes (PyTorch layout)."""
    ks = jax.random.split(key, 6)
    scale = 1.0 / jnp.sqrt(jnp.float32(input_dim))
    return {
        "w0": jax.random.uniform(ks[0], (input_dim, input_dim), jnp.float32, -scale, scale),
        "b0": jax.random.uniform(ks[1], (input_dim,), jnp.float32, -scale, scale),
        "w1": jax.random.uniform(ks[2], (input_dim, input_dim), jnp.float32, -scale, scale),
        "b1": jax.random.uniform(ks[3], (input_dim,), jnp.float32, -scale, scale),
        "w2": jax.random.uniform(ks[4], (1, input_dim), jnp.float32, -scale, scale),
        "b2": jax.random.uniform(ks[5], (1,), jnp.float32, -scale, scale),
    }


def _reference(x, p):
    h = jax.nn.relu(x @ p["w0"].T + p["b0"])
    h = jax.nn.relu(h @ p["w1"].T + p["b1"])
    return jax.nn.sigmoid(h @ p["w2"].T + p["b2"])


if __name__ == "__main__":
    key = jax.random.PRNGKey(0)
    k_x, k_p = jax.random.split(key)

    B, D = 8, 32  # small demo: batch of graph-level embeddings, hidden dim 32
    x = jax.random.normal(k_x, (B, D), dtype=jnp.float32)
    params = _init_params(k_p, D)
    prepared = prepare_params(params)   # one-time: transpose, bf16 cast, 128-pad

    out = prior_discriminator(x, prepared)
    out = jax.block_until_ready(out)

    ref = _reference(x, params)         # f32 reference
    assert out.shape == (B, 1), out.shape
    # bf16 MXU operands -> loosened tolerance vs. the f32 reference.
    assert jnp.allclose(out, ref, atol=2e-2, rtol=2e-2), (out, ref)

    print("KERNEL_OK")
</pallas_src>

<mosaic_0001>
module attributes {stable_mosaic.version = 11 : i64} {
  func.func @_prior_disc_kernel(%arg0: i32, %arg1: memref<8x32xf32, #tpu.memory_space<vmem>>, %arg2: memref<32x128xbf16, #tpu.memory_space<vmem>>, %arg3: memref<1x128xf32, #tpu.memory_space<vmem>>, %arg4: memref<128x128xbf16, #tpu.memory_space<vmem>>, %arg5: memref<1x128xf32, #tpu.memory_space<vmem>>, %arg6: memref<1x128xf32, #tpu.memory_space<vmem>>, %arg7: memref<1x1xf32, #tpu.memory_space<vmem>>, %arg8: memref<8x1xf32, #tpu.memory_space<vmem>>) attributes {dimension_semantics = [#tpu.dimension_semantics<parallel>], iteration_bounds = array<i64: 1>, scalar_prefetch = 0 : i64, scratch_operands = 0 : i64, tpu.core_type = #tpu.core_type<tc>, window_params = [{transform_indices = @transform_0, window_bounds = array<i64: 8, 32>}, {pipeline_mode = #tpu.pipeline_mode<synchronous>, transform_indices = @transform_1, window_bounds = array<i64: 32, 128>}, {pipeline_mode = #tpu.pipeline_mode<synchronous>, transform_indices = @transform_2, window_bounds = array<i64: 1, 128>}, {pipeline_mode = #tpu.pipeline_mode<synchronous>, transform_indices = @transform_3, window_bounds = array<i64: 128, 128>}, {pipeline_mode = #tpu.pipeline_mode<synchronous>, transform_indices = @transform_4, window_bounds = array<i64: 1, 128>}, {pipeline_mode = #tpu.pipeline_mode<synchronous>, transform_indices = @transform_5, window_bounds = array<i64: 1, 128>}, {pipeline_mode = #tpu.pipeline_mode<synchronous>, transform_indices = @transform_6, window_bounds = array<i64: 1, 1>}, {transform_indices = @transform_7, window_bounds = array<i64: 8, 1>}]} {
    %c0 = arith.constant 0 : index
    %c0_0 = arith.constant 0 : index
    %0 = vector.load %arg1[%c0, %c0_0] : memref<8x32xf32, #tpu.memory_space<vmem>>, vector<8x32xf32>
    %1 = arith.truncf %0 : vector<8x32xf32> to vector<8x32xbf16>
    %c0_1 = arith.constant 0 : index
    %c0_2 = arith.constant 0 : index
    %2 = vector.load %arg2[%c0_1, %c0_2] : memref<32x128xbf16, #tpu.memory_space<vmem>>, vector<32x128xbf16>
    %cst = arith.constant dense<0.000000e+00> : vector<8x128xf32>
    %3 = tpu.matmul %1, %2, %cst {dimension_numbers = #tpu.dot_dimension_numbers<[1], [0], [0], [1], [0, 0, 1, 1], [], []>} : vector<8x32xbf16>, vector<32x128xbf16>, vector<8x128xf32> -> vector<8x128xf32>
    %c0_3 = arith.constant 0 : index
    %c0_4 = arith.constant 0 : index
    %4 = vector.load %arg3[%c0_3, %c0_4] : memref<1x128xf32, #tpu.memory_space<vmem>>, vector<1x128xf32>
    %5 = vector.broadcast %4 : vector<1x128xf32> to vector<8x128xf32>
    %6 = arith.addf %3, %5 : vector<8x128xf32>
    %cst_5 = arith.constant 0.000000e+00 : f32
    %7 = vector.broadcast %cst_5 : f32 to vector<8x128xf32>
    %8 = arith.maximumf %6, %7 : vector<8x128xf32>
    %9 = arith.truncf %8 : vector<8x128xf32> to vector<8x128xbf16>
    %c0_6 = arith.constant 0 : index
    %c0_7 = arith.constant 0 : index
    %10 = vector.load %arg4[%c0_6, %c0_7] : memref<128x128xbf16, #tpu.memory_space<vmem>>, vector<128x128xbf16>
    %cst_8 = arith.constant dense<0.000000e+00> : vector<8x128xf32>
    %11 = tpu.matmul %9, %10, %cst_8 {dimension_numbers = #tpu.dot_dimension_numbers<[1], [0], [0], [1], [0, 0, 1, 1], [], []>} : vector<8x128xbf16>, vector<128x128xbf16>, vector<8x128xf32> -> vector<8x128xf32>
    %c0_9 = arith.constant 0 : index
    %c0_10 = arith.constant 0 : index
    %12 = vector.load %arg5[%c0_9, %c0_10] : memref<1x128xf32, #tpu.memory_space<vmem>>, vector<1x128xf32>
    %13 = vector.broadcast %12 : vector<1x128xf32> to vector<8x128xf32>
    %14 = arith.addf %11, %13 : vector<8x128xf32>
    %cst_11 = arith.constant 0.000000e+00 : f32
    %15 = vector.broadcast %cst_11 : f32 to vector<8x128xf32>
    %16 = arith.maximumf %14, %15 : vector<8x128xf32>
    %c0_12 = arith.constant 0 : index
    %c0_13 = arith.constant 0 : index
    %17 = vector.load %arg6[%c0_12, %c0_13] : memref<1x128xf32, #tpu.memory_space<vmem>>, vector<1x128xf32>
    %18 = vector.broadcast %17 : vector<1x128xf32> to vector<8x128xf32>
    %19 = arith.mulf %16, %18 : vector<8x128xf32>
    %cst_14 = arith.constant dense<0.000000e+00> : vector<8xf32>
    %20 = vector.multi_reduction <add>, %19, %cst_14 [1] : vector<8x128xf32> to vector<8xf32>
    %21 = vector.shape_cast %20 : vector<8xf32> to vector<8x1xf32>
    %c0_15 = arith.constant 0 : index
    %c0_16 = arith.constant 0 : index
    %22 = vector.load %arg7[%c0_15, %c0_16] : memref<1x1xf32, #tpu.memory_space<vmem>>, vector<1x1xf32>
    %23 = vector.broadcast %22 : vector<1x1xf32> to vector<8x1xf32>
    %24 = arith.addf %21, %23 : vector<8x1xf32>
    %25 = arith.negf %24 : vector<8x1xf32>
    %26 = math.exp %25 : vector<8x1xf32>
    %cst_17 = arith.constant 1.000000e+00 : f32
    %27 = vector.broadcast %cst_17 : f32 to vector<8x1xf32>
    %28 = arith.addf %27, %26 : vector<8x1xf32>
    %29 = arith.divf %27, %28 : vector<8x1xf32>
    %c0_18 = arith.constant 0 : index
    %c0_19 = arith.constant 0 : index
    %30 = vector.load %arg8[%c0_18, %c0_19] : memref<8x1xf32, #tpu.memory_space<vmem>>, vector<8x1xf32>
    tpu.vector_store %arg8[%c0_18, %c0_19], %29 {strides = array<i32>} : memref<8x1xf32, #tpu.memory_space<vmem>>, vector<8x1xf32>,
    return
  }
  func.func @transform_0(%arg0: i32) -> (i32, i32) {
    %c0_i32 = arith.constant 0 : i32
    %c0_i32_0 = arith.constant 0 : i32
    return %arg0, %c0_i32 : i32, i32
  }
  func.func @transform_1(%arg0: i32) -> (i32, i32) {
    %c0_i32 = arith.constant 0 : i32
    %c0_i32_0 = arith.constant 0 : i32
    %c0_i32_1 = arith.constant 0 : i32
    return %c0_i32, %c0_i32_0 : i32, i32
  }
  func.func @transform_2(%arg0: i32) -> (i32, i32) {
    %c0_i32 = arith.constant 0 : i32
    %c0_i32_0 = arith.constant 0 : i32
    %c0_i32_1 = arith.constant 0 : i32
    return %c0_i32, %c0_i32_0 : i32, i32
  }
  func.func @transform_3(%arg0: i32) -> (i32, i32) {
    %c0_i32 = arith.constant 0 : i32
    %c0_i32_0 = arith.constant 0 : i32
    %c0_i32_1 = arith.constant 0 : i32
    return %c0_i32, %c0_i32_0 : i32, i32
  }
  func.func @transform_4(%arg0: i32) -> (i32, i32) {
    %c0_i32 = arith.constant 0 : i32
    %c0_i32_0 = arith.constant 0 : i32
    %c0_i32_1 = arith.constant 0 : i32
    return %c0_i32, %c0_i32_0 : i32, i32
  }
  func.func @transform_5(%arg0: i32) -> (i32, i32) {
    %c0_i32 = arith.constant 0 : i32
    %c0_i32_0 = arith.constant 0 : i32
    %c0_i32_1 = arith.constant 0 : i32
    return %c0_i32, %c0_i32_0 : i32, i32
  }
  func.func @transform_6(%arg0: i32) -> (i32, i32) {
    %c0_i32 = arith.constant 0 : i32
    %c0_i32_0 = arith.constant 0 : i32
    %c0_i32_1 = arith.constant 0 : i32
    return %c0_i32, %c0_i32_0 : i32, i32
  }
  func.func @transform_7(%arg0: i32) -> (i32, i32) {
    %c0_i32 = arith.constant 0 : i32
    %c0_i32_0 = arith.constant 0 : i32
    return %arg0, %c0_i32 : i32, i32
  }
}

</mosaic_0001>

<bundles_post_ra>
// kernel: tpu_custom_call.1
= control target key start
LH: loop header
LB: loop body
LE: loop exit
PB: predicated region body
PF: predicated region fallthrough
CT: control target
= control target key end

     0   :  { %s534_s0 = inlined_call_operand.hbm [shape: f32[8,32], index: 0, kind: input, shape index: {}]   ;;  %s535_s1 = inlined_call_operand.hbm [shape: bf16[32,128], index: 1, kind: input, shape index: {}]   ;;  %s536_s2 = inlined_call_operand.vmem [shape: f32[1,128], index: 2, kind: input, shape index: {}]   ;;  %s537_s3 = inlined_call_operand.hbm [shape: bf16[128,128], index: 3, kind: input, shape index: {}]   ;;  %s538_s4 = inlined_call_operand.vmem [shape: f32[1,128], index: 4, kind: input, shape index: {}]   ;;  %s539_s5 = inlined_call_operand.vmem [shape: f32[1,128], index: 5, kind: input, shape index: {}]   ;;  %s540_s6 = inlined_call_operand.<no memory space> [shape: f32[1,1], index: 6, kind: input, shape index: {}]   ;;  %s541_s7 = inlined_call_operand.vmem [shape: f32[8,1], index: 7, kind: output, shape index: {}]  }
   0x1   :  { %v12_v0 = vstv %s540_s6 }
   0x2   :  { %13 = vst [vmem:[#allocation2] sm:$0x1] %v12_v0 }
   0x3   :  { %14 = vsyncpa [#allocation4], 0 }
   0x4   :  { %15 = vsyncpa [#allocation6], 0  ;;  %s430_s26 = smov [#allocation5]   ;;  %s360_s30 = scalar_lea.hbm %s535_s1, 256 }
   0x5   :  { %s31_s27 = sshll.u32 %s430_s26, 4  ;;  %p361_p0 = scmp.ne.s32.totalorder %s535_s1, %s360_s30  ;;  %s32_s27 = int_to_ptr.vmem [resolvable:$true] %s31_s27 }
   0x6   :  { %p364_p1 = scmp.lt.u32.totalorder %s360_s30, %s535_s1 }
   0x8   :  { %p366_p2 = pnand %p364_p1, %p361_p0 }
   0xa   :  { %369 = shalt.err (!%p366_p2)
}
   0xb   :  { %s370_s6 = scalar_lea.vmem %s32_s27, 256  ;;  %p375_p4 = scmp.lt.s32.totalorder %s32_s27, %s32_s27 }
   0xc   :  { %p371_p3 = scmp.ne.s32.totalorder %s32_s27, %s370_s6  ;;  %p376_p5 = scmp.lt.s32.totalorder %s370_s6, %s370_s6 }
   0xe   :  { %p377_p6 = por %p376_p5, %p375_p4 }
  0x10   :  { %p378_p7 = pnand %p377_p6, %p371_p3 }
  0x12   :  { %381 = shalt.err (!%p378_p7)
}
  0x13   :  { %s431_s12 = smov 64   ;;  %s432_s13 = smov 4  }
  0x14   :  { %37 = dma.hbm_to_vmem [thread:$0]  %s535_s1, 256, %s32_s27, [#allocation6], %s431_s12, %s431_s12, %s432_s13  }
  0x15   :  { %s433_s16 = smov [#allocation3]   ;;  %s434_s18 = smov [#allocation7]  }
  0x16   :  { %s22_s17 = sshll.u32 %s433_s16, 4  ;;  %s45_s19 = sshll.u32 %s434_s18, 4  ;;  %s23_s17 = int_to_ptr.vmem [resolvable:$true] %s22_s17  ;;  %s46_s19 = int_to_ptr.vmem [resolvable:$true] %s45_s19 }
  0x17   :  { %s382_s22 = scalar_lea.hbm %s534_s0, 128 }
  0x18   :  { %p383_p8 = scmp.ne.s32.totalorder %s534_s0, %s382_s22  ;;  %p386_p9 = scmp.lt.u32.totalorder %s382_s22, %s534_s0 }
  0x1a   :  { %p388_p10 = pnand %p386_p9, %p383_p8 }
  0x1c   :  { %391 = shalt.err (!%p388_p10)
}
  0x1d   :  { %s392_s1 = scalar_lea.vmem %s23_s17, 128  ;;  %p397_p12 = scmp.lt.s32.totalorder %s23_s17, %s23_s17 }
  0x1e   :  { %p393_p11 = scmp.ne.s32.totalorder %s23_s17, %s392_s1  ;;  %p398_p13 = scmp.lt.s32.totalorder %s392_s1, %s392_s1 }
  0x20   :  { %p399_p0 = por %p398_p13, %p397_p12 }
  0x22   :  { %p400_p1 = pnand %p399_p0, %p393_p11 }
  0x24   :  { %403 = shalt.err (!%p400_p1)
}
  0x25   :  { %25 = dma.hbm_to_vmem [thread:$0]  %s534_s0, 128, %s23_s17, [#allocation4]  }
  0x26   :  { %s404_s8 = scalar_lea.hbm %s537_s3, 1024 }
  0x27   :  { %p405_p2 = scmp.ne.s32.totalorder %s537_s3, %s404_s8  ;;  %p408_p3 = scmp.lt.u32.totalorder %s404_s8, %s537_s3 }
  0x29   :  { %p410_p4 = pnand %p408_p3, %p405_p2 }
  0x2b   :  { %413 = shalt.err (!%p410_p4)
}
  0x2c   :  { %s414_s14 = scalar_lea.vmem %s46_s19, 1024  ;;  %p419_p6 = scmp.lt.s32.totalorder %s46_s19, %s46_s19 }
  0x2d   :  { %p415_p5 = scmp.ne.s32.totalorder %s46_s19, %s414_s14  ;;  %p420_p7 = scmp.lt.s32.totalorder %s414_s14, %s414_s14 }
  0x2f   :  { %p421_p8 = por %p420_p7, %p419_p6 }
  0x31   :  { %p422_p9 = pnand %p421_p8, %p415_p5 }
  0x33   :  { %425 = shalt.err (!%p422_p9)
}
  0x34   :  { %51 = dma.hbm_to_vmem [thread:$0]  %s537_s3, 1024, %s46_s19, [#allocation6], %s431_s12, %s431_s12, %s432_s13  }
  0x35   :  { %426 = dma.done.wait [#allocation4], 128  }
  0x36   :  { %427 = vsyncadd [#allocation4], 4294967168 }
  0x37   :  { %428 = dma.done.wait [#allocation6], 1280  }
  0x38   :  { %429 = vsyncadd [#allocation6], 4294966016  ;;  %v435_v1 = vmov 0.0   ;;  %vm436_vm0 = vmmov 0   ;;  %v346_v2 = vld [vmem:[#allocation5] sm:$0xff]   ;;  %v347_v3 = vld [vmem:[#allocation5 + $0x8] sm:$0xff]  }
  0x39   :  { %311 = vmatprep.subr.bf16.mxu0 %v435_v1  ;;  %315 = vmatprep.mubr.msk.bf16.mxu0 %vm436_vm0, %v435_v1  ;;  %v68_v4 = vld [vmem:[#allocation3] sm:$0xff]  ;;  %v348_v5 = vld [vmem:[#allocation7] sm:$0xff]   ;;  %vm93_vm1 = vcmask 261120   ;;  %v350_v8 = vld [vmem:[#allocation7 + $0x10] sm:$0xff]   ;;  %vm275_vm2 = vcmask 7168  }
  0x3a   :  { %319 = vmatprep.subr.bf16.mxu1 %v435_v1  ;;  %335 = vmatprep.mubr.msk.bf16.mxu1 %vm436_vm0, %v435_v1  ;;  %v69_v6 = vpack.c.bf16 %v68_v4, %v68_v4  ;;  %v349_v7 = vld [vmem:[#allocation7 + $0x8] sm:$0xff]   ;;  %v351_v9 = vld [vmem:[#allocation7 + $0x18] sm:$0xff]   ;;  %v352_v10 = vld [vmem:[#allocation7 + $0x20] sm:$0xff]  }
  0x3b   :  { %312 = vmatpush3.bf16.msra.mxu0 %v346_v2  ;;  %320 = vmatpush3.bf16.msra.mxu1 %v348_v5  ;;  %v353_v11 = vld [vmem:[#allocation7 + $0x28] sm:$0xff]   ;;  %v354_v12 = vld [vmem:[#allocation7 + $0x30] sm:$0xff]   ;;  %v355_v13 = vld [vmem:[#allocation7 + $0x38] sm:$0xff]  }
  0x3c   :  { %313 = vmatprep.subr.bf16.mxu0 %v435_v1  ;;  %321 = vmatprep.subr.bf16.mxu1 %v435_v1  ;;  %v283_v14 = vld [vmem:[%s536_s2] ss:$0 sm:$0xff] }
  0x3d   :  { %v287_v22 = vld [vmem:[%s538_s4] ss:$0 sm:$0xff] }
  0x3e   :  { %v296_v27 = vld [vmem:[%s539_s5] ss:$0 sm:$0xff] }
  0x3f   :  { %314 = vmatpush3.bf16.msra.mxu0 %v347_v3  ;;  %322 = vmatpush3.bf16.msra.mxu1 %v349_v7  ;;  %v297_v31 = vld [vmem:[#allocation2] ss:$0 sm:$0xff] }
  0x40   :  { %323 = vmatprep.subr.bf16.mxu1 %v435_v1 }
  0x42   :  { %316 = vmatmul.mubr.msk.bf16.vlgmr.msra.gmra.mrb[0].mxu0 %vm93_vm1, %v69_v6 }
  0x43   :  { %324 = vmatpush3.bf16.msra.mxu1 %v350_v8 }
  0x44   :  { %325 = vmatprep.subr.bf16.mxu1 %v435_v1 }
  0x47   :  { %326 = vmatpush3.bf16.msra.mxu1 %v351_v9 }
  0x48   :  { %327 = vmatprep.subr.bf16.mxu1 %v435_v1 }
  0x4b   :  { %328 = vmatpush3.bf16.msra.mxu1 %v352_v10 }
  0x4c   :  { %329 = vmatprep.subr.bf16.mxu1 %v435_v1 }
  0x4f   :  { %330 = vmatpush3.bf16.msra.mxu1 %v353_v11 }
  0x50   :  { %331 = vmatprep.subr.bf16.mxu1 %v435_v1 }
  0x53   :  { %332 = vmatpush3.bf16.msra.mxu1 %v354_v12 }
  0x54   :  { %333 = vmatprep.subr.bf16.mxu1 %v435_v1 }
  0x57   :  { %334 = vmatpush3.bf16.msra.mxu1 %v355_v13 }
 0x115   :  { %v131_v15 = vpop.f32.mrb[0].mxu0 }
 0x116   :  { %v132_v16 = vadd.f32 %v283_v14, %v131_v15  ;;  %v317_v17 = vpop.f32.mrb[1].mxu0 }
 0x117   :  { %v134_v18 = vpop.f32.mrb[2].mxu0 }
 0x118   :  { %v137_v19 = vmax.f32 %v132_v16, 0.0  ;;  %v318_v20 = vpop.f32.mrb[3].mxu0 }
 0x11a   :  { %v138_v21 = vpack.c.bf16 %v137_v19, %v137_v19 }
 0x11c   :  { %336 = vmatmul.mubr.bf16.vlgmr.msra.gmra.mrb[0].mxu1 %v138_v21 }
 0x1ef   :  { %v244_v23 = vpop.f32.mrb[0].mxu1 }
 0x1f0   :  { %v245_v24 = vadd.f32 %v287_v22, %v244_v23  ;;  %v337_v25 = vpop.f32.mrb[1].mxu1 }
 0x1f1   :  { %v247_v26 = vpop.f32.mrb[2].mxu1 }
 0x1f2   :  { %v250_v28 = vmax.f32 %v245_v24, 0.0  ;;  %v338_v29 = vpop.f32.mrb[3].mxu1 }
 0x1f4   :  { %v258_v30 = vmul.f32 %v296_v27, %v250_v28 }
 0x1f6   :  { %259 = vadd.xlane.f32.xlu0 %v258_v30 }
 0x283   :  { %v260_v32 = vpop.xlane.xlu0 %259 }
 0x284   :  { %v268_v33 = vadd.f32 %v297_v31, %v260_v32 }
 0x286   :  { %v298_v34 = vmul.f32 -1.442695, %v268_v33 }
 0x288   :  { %356 = vpow2.f32 %v298_v34 }
 0x292   :  { %v357_v35 = vpop.eup %356 }
 0x293   :  { %v272_v36 = vadd.f32 1.0, %v357_v35 }
 0x295   :  { %358 = vrcp.f32 %v272_v36 }
 0x29f   :  { %v359_v37 = vpop.eup %358 }
 0x2a0   :  { %276 = vst.msk [vmem:[%s541_s7] sm:$0xff] %vm275_vm2, %v359_v37 }
 0x2a1   :  { %281 = vsyncpa [#allocation4], 1 }
 0x2a2   :  { %282 = vsyncpa [#allocation6], 1 }

</bundles_post_ra>
